<compile_context>
chip_gen: v6e
topology: v6e:2x2x1
jax: 0.10.0
libtpu: 0.0.40
codegen_flags: <defaults>
</compile_context>

<pallas_src>
import jax
import jax.numpy as jnp
from jax.experimental import pallas as pl
from jax.experimental.pallas import tpu as pltpu


def _round_up(x, m):
    return ((x + m - 1) // m) * m


# ---------------------------------------------------------------------------
# Kernels
# ---------------------------------------------------------------------------

def _make_fullk_kernel(has_res_input):
    """Full-K kernel: grid = (M tiles, N tiles); no reduction axis, no scratch."""
    if has_res_input:
        def kernel(x_ref, w_ref, b_ref, r_ref, o_ref):
            acc = jnp.dot(x_ref[...], w_ref[...],
                          preferred_element_type=jnp.float32)
            acc += b_ref[...].astype(jnp.float32)
            acc += r_ref[...].astype(jnp.float32)
            o_ref[...] = acc.astype(o_ref.dtype)
    else:
        # Only used when tn == H_pad: the lhs tile IS the residual tile.
        def kernel(x_ref, w_ref, b_ref, o_ref):
            acc = jnp.dot(x_ref[...], w_ref[...],
                          preferred_element_type=jnp.float32)
            acc += b_ref[...].astype(jnp.float32)
            acc += x_ref[...].astype(jnp.float32)
            o_ref[...] = acc.astype(o_ref.dtype)
    return kernel


def _make_tiled_kernel(has_res_input):
    """Tiled-K kernel: grid = (M, N, K), K last ("arbitrary"), f32 accumulator."""
    if has_res_input:
        def kernel(x_ref, w_ref, b_ref, r_ref, o_ref, acc_ref):
            k = pl.program_id(2)
            part = jnp.dot(x_ref[...], w_ref[...],
                           preferred_element_type=jnp.float32)

            @pl.when(k == 0)
            def _init():                       # fold bias into the init, no zero-fill
                acc_ref[...] = part + b_ref[...].astype(jnp.float32)

            @pl.when(k > 0)
            def _acc():
                acc_ref[...] += part

            @pl.when(k == pl.num_programs(2) - 1)
            def _epilogue():
                o_ref[...] = (acc_ref[...]
                              + r_ref[...].astype(jnp.float32)).astype(o_ref.dtype)
    else:
        # Requires tn == tk: the lhs tile at k == j is exactly the residual tile.
        def kernel(x_ref, w_ref, b_ref, o_ref, acc_ref):
            j = pl.program_id(1)
            k = pl.program_id(2)
            part = jnp.dot(x_ref[...], w_ref[...],
                           preferred_element_type=jnp.float32)

            @pl.when(k == 0)
            def _init():
                acc_ref[...] = part + b_ref[...].astype(jnp.float32)

            @pl.when(k > 0)
            def _acc():
                acc_ref[...] += part

            @pl.when(k == j)
            def _residual():                   # residual folded from the lhs tile
                acc_ref[...] += x_ref[...].astype(jnp.float32)

            @pl.when(k == pl.num_programs(2) - 1)
            def _epilogue():
                o_ref[...] = acc_ref[...].astype(o_ref.dtype)
    return kernel


# ---------------------------------------------------------------------------
# Wrapper
# ---------------------------------------------------------------------------

def residual_linear(x, w, b, *,
                    compute_dtype=jnp.bfloat16,
                    exact_f32_residual=False,
                    tm_max=512, tn_max=512, fullk_max=2048):
    """Residual(nn.Linear(H, H)) forward:  out = x @ w.T + b + x.

    x: (B, S, H);  w: (H, H) in PyTorch (out_features, in_features) layout;
    b: (H,).  Returns (B, S, H) in x.dtype.
    compute_dtype: MXU operand dtype (default bf16; pass jnp.float32 for a
      bit-tight debug mode).  Accumulation / bias / residual math is f32.
    exact_f32_residual: opt-in separate f32 residual stream (exact `+ x` even
      under bf16 compute) at the cost of one extra HBM pass over x.
    """
    B, S, H = x.shape
    M = B * S
    out_dtype = x.dtype
    mm_dtype = jnp.dtype(compute_dtype if compute_dtype is not None else x.dtype)
    mm_size = mm_dtype.itemsize
    out_size = jnp.dtype(out_dtype).itemsize

    # ---- feature (lane) tiling: multiples of 128, lane-dense output tiles ----
    H_pad = _round_up(H, 128)
    tn_cap = max(128, (min(tn_max, H_pad) // 128) * 128)
    tn = 128
    for t in range(tn_cap, 0, -128):
        if H_pad % t == 0:
            tn = t
            break

    # ---- row tiling: biggest tile whose zero-padding waste stays <= ~12.5% ----
    cands = sorted({t for t in (tm_max, 512, 256, 128, 64, 32, 16, 8)
                    if 8 <= t <= tm_max and t % 8 == 0}, reverse=True) or [8]
    tm = cands[-1]
    for t in cands:
        if _round_up(M, t) - M <= max(M // 8, 0):
            tm = t
            break
    M_pad = _round_up(M, tm)
    gm, gn = M_pad // tm, H_pad // tn

    # v7x has 2 TensorCores sharded over "parallel" axes: avoid a 1-tile grid.
    if gm * gn < 2 and tm > 8 and M_pad >= 16:
        tm = max(8, tm // 2)
        M_pad = _round_up(M, tm)
        gm = M_pad // tm

    # ---- per-generation VMEM budget (v7x: 64 MiB/TC; v5e/v6e: 128 MiB) ----
    try:
        vmem_cap = int(pltpu.get_tpu_info().vmem_capacity_bytes)
    except Exception:
        vmem_cap = 64 * 1024 * 1024            # assume the smallest (v7x per-TC)
    budget = min(64 * 1024 * 1024, int(vmem_cap * 5 // 8))

    # ---- full-K (no reduction axis, no acc scratch) vs tiled-K ----
    def _fullk_vmem():
        res = 2 * tm * tn * (4 if exact_f32_residual else (mm_size if gn > 1 else 0))
        return (2 * (tm * H_pad + H_pad * tn) * mm_size     # double-buffered lhs/rhs
                + 2 * tn * 4 + res + 2 * tm * tn * out_size)

    use_fullk = (H_pad <= fullk_max) and (_fullk_vmem() <= budget)

    # ---- pad to tile multiples (identity when already aligned) ----
    x2d = x.reshape(M, H)
    x_pad = jnp.pad(x2d, ((0, M_pad - M), (0, H_pad - H)))
    # One HBM-side transpose of W (out,in) -> (in,out) = canonical (K, N) rhs
    # layout, so the kernel never needs a per-tile XLU transpose.
    w_t = jnp.pad(w.T, ((0, H_pad - H), (0, H_pad - H)))
    b_pad = jnp.pad(b.astype(jnp.float32), (0, H_pad - H)).reshape(1, H_pad)

    x_mm = x_pad.astype(mm_dtype)
    w_mm = w_t.astype(mm_dtype)

    cost = pl.CostEstimate(
        flops=2 * M_pad * H_pad * H_pad,
        transcendentals=0,
        bytes_accessed=(x_pad.size * mm_size + w_t.size * mm_size
                        + b_pad.size * 4
                        + (x_pad.size * 4 if exact_f32_residual else 0)
                        + M_pad * H_pad * out_size))

    if use_fullk:
        has_res = exact_f32_residual or gn > 1
        kernel = _make_fullk_kernel(has_res)
        grid = (gm, gn)
        in_specs = [
            pl.BlockSpec((tm, H_pad), lambda i, j: (i, 0)),   # lhs, full K, resident over j
            pl.BlockSpec((H_pad, tn), lambda i, j: (0, j)),   # W^T tile (K, N)
            pl.BlockSpec((1, tn), lambda i, j: (0, j)),       # bias
        ]
        args = [x_mm, w_mm, b_pad]
        if has_res:
            in_specs.append(pl.BlockSpec((tm, tn), lambda i, j: (i, j)))
            args.append(x_pad.astype(jnp.float32) if exact_f32_residual else x_mm)
        out_spec = pl.BlockSpec((tm, tn), lambda i, j: (i, j))
        scratch = []
        dims = ("parallel", "parallel")
    else:
        tk = tn                    # tn == tk so the k == j lhs tile is the residual
        gk = H_pad // tk
        has_res = exact_f32_residual
        kernel = _make_tiled_kernel(has_res)
        grid = (gm, gn, gk)
        in_specs = [
            pl.BlockSpec((tm, tk), lambda i, j, k: (i, k)),   # lhs
            pl.BlockSpec((tk, tn), lambda i, j, k: (k, j)),   # W^T tile (K, N)
            pl.BlockSpec((1, tn), lambda i, j, k: (0, j)),    # bias
        ]
        args = [x_mm, w_mm, b_pad]
        if has_res:
            in_specs.append(pl.BlockSpec((tm, tn), lambda i, j, k: (i, j)))
            args.append(x_pad.astype(jnp.float32))
        out_spec = pl.BlockSpec((tm, tn), lambda i, j, k: (i, j))
        scratch = [pltpu.VMEM((tm, tn), jnp.float32)]
        dims = ("parallel", "parallel", "arbitrary")

    out2d = pl.pallas_call(
        kernel,
        out_shape=jax.ShapeDtypeStruct((M_pad, H_pad), out_dtype),
        grid_spec=pltpu.PrefetchScalarGridSpec(
            num_scalar_prefetch=0,
            grid=grid,
            in_specs=in_specs,
            out_specs=out_spec,
            scratch_shapes=scratch),
        compiler_params=pltpu.CompilerParams(
            dimension_semantics=dims,
            vmem_limit_bytes=budget),
        cost_estimate=cost,
    )(*args)

    return out2d[:M, :H].reshape(B, S, H)


# ---------------------------------------------------------------------------
# Demo / correctness checks
# ---------------------------------------------------------------------------

if __name__ == "__main__":
    key = jax.random.PRNGKey(0)
    kx, kw, kb, kx2, kw2, kb2 = jax.random.split(key, 6)

    def make_inputs(kx, kw, kb, B, S, H):
        x = jax.random.normal(kx, (B, S, H), dtype=jnp.float32)
        bound = 1.0 / (H ** 0.5)               # nn.Linear-style init
        w = jax.random.uniform(kw, (H, H), minval=-bound, maxval=bound,
                               dtype=jnp.float32)
        b = jax.random.uniform(kb, (H,), minval=-bound, maxval=bound,
                               dtype=jnp.float32)
        ref = jnp.einsum("bsh,oh->bso", x, w) + b + x     # Residual semantics
        return x, w, b, ref

    # --- small shape: B=2, S=8, H=32 ---
    x, w, b, ref = make_inputs(kx, kw, kb, 2, 8, 32)

    # 1) default bf16 MXU path (full-K, folded residual)
    out = jax.block_until_ready(residual_linear(x, w, b))
    assert out.shape == x.shape and out.dtype == x.dtype
    assert jnp.allclose(out, ref, atol=6e-2, rtol=2e-2)

    # 2) f32 debug/check mode — tight tolerance
    out32 = jax.block_until_ready(residual_linear(x, w, b,
                                                  compute_dtype=jnp.float32))
    assert jnp.allclose(out32, ref, atol=1e-4, rtol=1e-4)

    # --- non-128 H to exercise padding + multi-tile N: B=2, S=8, H=288 ---
    x2, w2, b2, ref2 = make_inputs(kx2, kw2, kb2, 2, 8, 288)

    # 3) full-K with gn > 1 (residual via bf16 lhs re-tile)
    out3 = jax.block_until_ready(residual_linear(x2, w2, b2, tn_max=128))
    assert jnp.allclose(out3, ref2, atol=6e-2, rtol=2e-2)

    # 4) tiled-K path (forced), residual folded at k == j
    out4 = jax.block_until_ready(
        residual_linear(x2, w2, b2, tn_max=128, fullk_max=128))
    assert jnp.allclose(out4, ref2, atol=6e-2, rtol=2e-2)

    # 5) tiled-K path with exact f32 residual + f32 compute — tight tolerance
    out5 = jax.block_until_ready(
        residual_linear(x2, w2, b2, compute_dtype=jnp.float32,
                        exact_f32_residual=True, tn_max=128, fullk_max=128))
    assert jnp.allclose(out5, ref2, atol=1e-4, rtol=1e-4)

    print("KERNEL_OK")
</pallas_src>

<mosaic_0001>
module attributes {stable_mosaic.version = 11 : i64} {
  func.func @kernel(%arg0: i32, %arg1: i32, %arg2: memref<8x128xbf16, #tpu.memory_space<vmem>>, %arg3: memref<128x128xbf16, #tpu.memory_space<vmem>>, %arg4: memref<1x128xf32, #tpu.memory_space<vmem>>, %arg5: memref<8x128xf32, #tpu.memory_space<vmem>>) attributes {dimension_semantics = [#tpu.dimension_semantics<parallel>, #tpu.dimension_semantics<parallel>], iteration_bounds = array<i64: 2, 1>, scalar_prefetch = 0 : i64, scratch_operands = 0 : i64, tpu.core_type = #tpu.core_type<tc>, window_params = [{transform_indices = @transform_0, window_bounds = array<i64: 8, 128>}, {transform_indices = @transform_1, window_bounds = array<i64: 128, 128>}, {transform_indices = @transform_2, window_bounds = array<i64: 1, 128>}, {transform_indices = @transform_3, window_bounds = array<i64: 8, 128>}]} {
    %c0 = arith.constant 0 : index
    %c0_0 = arith.constant 0 : index
    %0 = vector.load %arg2[%c0, %c0_0] : memref<8x128xbf16, #tpu.memory_space<vmem>>, vector<8x128xbf16>
    %c0_1 = arith.constant 0 : index
    %c0_2 = arith.constant 0 : index
    %1 = vector.load %arg3[%c0_1, %c0_2] : memref<128x128xbf16, #tpu.memory_space<vmem>>, vector<128x128xbf16>
    %cst = arith.constant dense<0.000000e+00> : vector<8x128xf32>
    %2 = tpu.matmul %0, %1, %cst {dimension_numbers = #tpu.dot_dimension_numbers<[1], [0], [0], [1], [0, 0, 1, 1], [], []>} : vector<8x128xbf16>, vector<128x128xbf16>, vector<8x128xf32> -> vector<8x128xf32>
    %c0_3 = arith.constant 0 : index
    %c0_4 = arith.constant 0 : index
    %3 = vector.load %arg4[%c0_3, %c0_4] : memref<1x128xf32, #tpu.memory_space<vmem>>, vector<1x128xf32>
    %4 = vector.broadcast %3 : vector<1x128xf32> to vector<8x128xf32>
    %5 = arith.addf %2, %4 : vector<8x128xf32>
    %c0_5 = arith.constant 0 : index
    %c0_6 = arith.constant 0 : index
    %6 = vector.load %arg2[%c0_5, %c0_6] : memref<8x128xbf16, #tpu.memory_space<vmem>>, vector<8x128xbf16>
    %7 = arith.extf %6 : vector<8x128xbf16> to vector<8x128xf32>
    %8 = arith.addf %5, %7 : vector<8x128xf32>
    %c0_7 = arith.constant 0 : index
    %c0_8 = arith.constant 0 : index
    %9 = vector.load %arg5[%c0_7, %c0_8] : memref<8x128xf32, #tpu.memory_space<vmem>>, vector<8x128xf32>
    tpu.vector_store %arg5[%c0_7, %c0_8], %8 {strides = array<i32>} : memref<8x128xf32, #tpu.memory_space<vmem>>, vector<8x128xf32>,
    return
  }
  func.func @transform_0(%arg0: i32, %arg1: i32) -> (i32, i32) {
    %c0_i32 = arith.constant 0 : i32
    %c0_i32_0 = arith.constant 0 : i32
    return %arg0, %c0_i32 : i32, i32
  }
  func.func @transform_1(%arg0: i32, %arg1: i32) -> (i32, i32) {
    %c0_i32 = arith.constant 0 : i32
    %c0_i32_0 = arith.constant 0 : i32
    return %c0_i32, %arg1 : i32, i32
  }
  func.func @transform_2(%arg0: i32, %arg1: i32) -> (i32, i32) {
    %c0_i32 = arith.constant 0 : i32
    %c0_i32_0 = arith.constant 0 : i32
    return %c0_i32, %arg1 : i32, i32
  }
  func.func @transform_3(%arg0: i32, %arg1: i32) -> (i32, i32) {
    %c0_i32 = arith.constant 0 : i32
    return %arg0, %arg1 : i32, i32
  }
}

</mosaic_0001>

<bundles_post_ra>
// kernel: tpu_custom_call.1
= control target key start
LH: loop header
LB: loop body
LE: loop exit
PB: predicated region body
PF: predicated region fallthrough
CT: control target
= control target key end

     0   :  { %8 = vsyncpa [#allocation3], 0  ;;  %s962_s0 = inlined_call_operand.hbm [shape: bf16[16,128], index: 0, kind: input, shape index: {}]   ;;  %s963_s1 = inlined_call_operand.hbm [shape: bf16[128,128], index: 1, kind: input, shape index: {}]   ;;  %s964_s2 = inlined_call_operand.vmem [shape: f32[1,128], index: 2, kind: input, shape index: {}]   ;;  %s965_s3 = inlined_call_operand.hbm [shape: f32[16,128], index: 3, kind: output, shape index: {}]  }
   0x1   :  { %10 = vsyncpa [#allocation3 + $0x1], 0 }
   0x2   :  { %11 = vsyncpa [#allocation6], 0 }
   0x3   :  { %12 = vsyncpa [#allocation4], 0 }
   0x4   :  { %14 = vsyncpa [#allocation4 + $0x1], 0  ;;  %s776_s12 = smov 0   ;;  %s778_s13 = smov 0  }
   0x5   :  { %s780_s14 = smov 0   ;;  %s782_s15 = smov 0  }
   0x6   :  { %s784_s16 = smov 0   ;;  %s786_s17 = smov 0  }
   0x7 LB: > { %s470_s18 = sadd.s32 4294967295, %s747_s17   ;;  %s471_s19 = sadd.s32 4294967294, %s747_s17   ;;  %s747_s17 = sphi %s786_s17, %s20_s17   ;;  %s743_s16 = sphi %s784_s16, %s983_s16   ;;  %s739_s15 = sphi %s782_s15, %s982_s15   ;;  %s735_s14 = sphi %s780_s14, %s981_s14   ;;  %s731_s13 = sphi %s778_s13, %s980_s13   ;;  %s727_s12 = sphi %s776_s12, %s979_s12  }
   0x8   : > { %p52_p0 = scmp.ne.s32.totalorder %s731_s13, %s727_s12  ;;  %p810_p1 = scmp.eq.s32.totalorder %s470_s18, 0 }
   0x9   : > { %p814_p2 = scmp.eq.s32.totalorder %s470_s18, 1  ;;  %p136_p3 = scmp.eq.s32.totalorder %s471_s19, 1 }
   0xa   : > { %p820_p4 = por %p810_p1, %p52_p0  ;;  %p472_p5 = scmp.ge.s32.totalorder %s747_s17, 1 }
   0xb   : > { %p825_p6 = por %p136_p3, %p52_p0  ;;  %p143_p7 = scmp.lt.s32.totalorder %s747_s17, 3 }
   0xc   : > { %s969_s22 = scalar_select %p820_p4, 1, 0 }
   0xd   : > { %s970_s23 = scalar_select %p825_p6, 1, 0 }
   0xe   : > { %p830_p8 = pnand %p472_p5, %p143_p7  ;;  %s749_s25 = smov [#allocation5]  }
   0xf   : > { %s157_s26 = sshll.u32 %s749_s25, 4  ;;  %s32_s28 = sadd.s32 1, %s743_s16  ;;  %s158_s26 = int_to_ptr.vmem [resolvable:$true] %s157_s26 }
  0x10   : > { %p532_p9 = pneg %p830_p8  ;;  %s620_s29 = scalar_lea.vmem %s158_s26, 1024 }
  0x11   : > { %p621_p13 = scmp.ne.s32.totalorder %s158_s26, %s620_s29  ;;  %p628_p5 = scmp.lt.s32.totalorder %s158_s26, %s158_s26 }
  0x12   : > { %p839_p11 = pnand %p532_p9, %p810_p1  ;;  %p629_p7 = scmp.lt.s32.totalorder %s620_s29, %s620_s29 }
  0x14   : > { %p611_p12 = pneg %p839_p11  ;;  %p630_p6 = por %p629_p7, %p628_p5 }
  0x16   : > { %p623_p0 = pnand %p621_p13, %p611_p12 }
  0x18   : > { %p624_p3 = pneg %p623_p0 }
  0x1a   : > { %p631_p4 = pnand %p630_p6, %p624_p3 }
  0x1c   : > { %634 = shalt.err (!%p631_p4)
}
  0x1d   : > { %s750_s30 = smov 64   ;;  %s751_s4 = smov 4  }
  0x1e   : > { %535 = dma.hbm_to_vmem [thread:$0]  (!%p839_p11), %s963_s1, 1024, %s158_s26, [#allocation6], %s750_s30, %s750_s30, %s751_s4  }
  0x1f   : > { %p34_p6 = scmp.ge.s32.totalorder %s32_s28, 2  ;;  %s39_s7 = sadd.s32 1, %s735_s14 }
  0x20   : > { %p46_p4 = scmp.ne.s32.totalorder %s735_s14, %s731_s13  ;;  %p47_p9 = scmp.eq.s32.totalorder %s747_s17, 0 }
  0x21   : > { %s985_s28 = smov (%p34_p6, %s32_s28), 0  ;;  %p545_p0 = scmp.lt.s32.totalorder %s747_s17, 2 }
  0x22   : > { %p857_p12 = por %p47_p9, %p46_p4  ;;  %p863_p13 = por %p814_p2, %p46_p4 }
  0x23   : > { %s36_s10 = ssub.s32 %s743_s16, %s985_s28  ;;  %s177_s11 = sand.u32 1, %s735_s14  }
  0x24   : > { %p37_p11 = scmp.eq.s32.totalorder %s36_s10, 0  ;;  %s476_s18 = sshll.u32 %s177_s11, 2 }
  0x25   : > { %s477_s25 = sshll.u32 %s743_s16, 6  ;;  %s181_s30 = scalar_lea.vmem [#allocation2], %s476_s18 }
  0x26   : > { %s872_s19 = scalar_select %p37_p11, %s735_s14, %s39_s7  }
  0x27   : > { %s186_s29 = scalar_lea.hbm %s962_s0, %s477_s25  ;;  %s188_s4 = sshll.u32 %s181_s30, 4  ;;  %s189_s4 = int_to_ptr.vmem [resolvable:$true] %s188_s4 }
  0x28   : > { %p880_p2 = pnand %p545_p0, %p857_p12  ;;  %s178_s5 = scalar_lea.sflag [#allocation3], %s177_s11 }
  0x29   : > { %s648_s6 = scalar_lea.vmem %s189_s4, 64  ;;  %s752_s7 = smov [#allocation2]  }
  0x2a   : > { %p637_p3 = pneg %p880_p2  ;;  %p649_p5 = scmp.ne.s32.totalorder %s189_s4, %s648_s6 }
  0x2b   : > { %s653_s10 = sshll.u32 %s752_s7, 4  ;;  %s654_s10 = int_to_ptr.vmem [resolvable:$false] %s653_s10 }
  0x2c   : > { %p651_p7 = pnand %p649_p5, %p637_p3  ;;  %s655_s25 = scalar_lea.vmem %s654_s10, 128 }
  0x2d   : > { %p656_p4 = scmp.lt.s32.totalorder %s189_s4, %s654_s10  ;;  %p657_p9 = scmp.lt.s32.totalorder %s655_s25, %s648_s6 }
  0x2e   : > { %p652_p6 = pneg %p651_p7 }
  0x2f   : > { %p658_p11 = por %p657_p9, %p656_p4 }
  0x31   : > { %p659_p10 = pnand %p658_p11, %p652_p6 }
  0x33   : > { %662 = shalt.err (!%p659_p10)
}
  0x34   : > { %539 = dma.hbm_to_vmem [thread:$0]  (!%p880_p2), %s186_s29, 64, %s189_s4, %s178_s5  }
  0x35   : > { %197 = sbr.rel (%p830_p8) target bundleno = 305 (0x131), region = 32  ;;  %s891_s8 = sand.u32 (!%p830_p8), 1, %s731_s13  }
  0x36   : > { %s479_s11 = sshll.u32 (!%p830_p8), %s891_s8, 2  ;;  %s200_s18 = scalar_lea.sflag (!%p830_p8), [#allocation3], %s891_s8 }
  0x37   : > { %s895_s26 = scalar_lea.vmem (!%p830_p8), [#allocation2], %s479_s11  ;;  %p976_p12 = scmp.ne.s32.totalorder (!%p830_p8), %s969_s22, 0 }
  0x3a   : > { %714 = dma.done.wait (%p976_p12), %s200_s18, 64  }
  0x3b   : > { %716 = vsyncadd (%p976_p12), %s200_s18, 4294967232 }
  0x3c   : > { %718 = dma.done.wait (%p810_p1), [#allocation6], 1024  }
  0x3d   : > { %720 = vsyncadd (%p810_p1), [#allocation6], 4294966272  ;;  %v753_v0 = vmov 0.0   ;;  %vm754_vm0 = vmmov 0   ;;  %v601_v1 = vld [vmem:[#allocation5 + $0x38] sm:$0xff]   ;;  %v602_v2 = vld [vmem:[#allocation5 + $0x30] sm:$0xff]  }
  0x3e   : > { %504 = vmatprep.subr.bf16.mxu0 %v753_v0  ;;  %520 = vmatprep.mubr.msk.bf16.mxu0 %vm754_vm0, %v753_v0  ;;  %v603_v3 = vld [vmem:[#allocation5 + $0x28] sm:$0xff]   ;;  %v604_v4 = vld [vmem:[#allocation5 + $0x20] sm:$0xff]   ;;  %v605_v5 = vld [vmem:[#allocation5 + $0x18] sm:$0xff]   ;;  %s481_s20 = sshll.u32 %s891_s8, 3  ;;  %s492_s27 = sshll.u32 %s739_s15, 7 }
  0x3f   : > { %505 = vmatpush3.bf16.msra.mxu0 %v601_v1  ;;  %v606_v6 = vld [vmem:[#allocation5 + $0x10] sm:$0xff]   ;;  %v607_v7 = vld [vmem:[#allocation5 + $0x8] sm:$0xff]   ;;  %v608_v8 = vld [vmem:[#allocation5] sm:$0xff]   ;;  %s232_s29 = scalar_lea.vmem [#allocation7], %s481_s20  ;;  %s914_s5 = scalar_lea.hbm %s965_s3, %s492_s27 }
  0x40   : > { %506 = vmatprep.subr.bf16.mxu0 %v753_v0  ;;  %v237_v9 = vld [vmem:[%s895_s26] sm:$0xf]  ;;  %s367_s30 = sshll.u32 %s232_s29, 4  ;;  %s353_s6 = scalar_lea.sflag [#allocation4], %s891_s8  ;;  %s916_s30 = int_to_ptr.vmem [resolvable:$true] %s367_s30 }
  0x41   : > { %v482_v10 = vld [vmem:[%s964_s2] ss:$0 sm:$0xff]  ;;  %v349_v11 = vunpack.c.l.bf16 %v237_v9  ;;  %s663_s15 = scalar_lea.vmem %s916_s30, 128  ;;  %s755_s7 = smov [#allocation7]  }
  0x42   : > { %p664_p1 = scmp.ne.s32.totalorder %s916_s30, %s663_s15  ;;  %s667_s10 = sshll.u32 %s755_s7, 4  ;;  %s668_s10 = int_to_ptr.vmem [resolvable:$false] %s667_s10 }
  0x43   : > { %507 = vmatpush3.bf16.msra.mxu0 %v602_v2  ;;  %s669_s25 = scalar_lea.vmem %s668_s10, 256  ;;  %p670_p0 = scmp.lt.s32.totalorder %s916_s30, %s668_s10 }
  0x44   : > { %508 = vmatprep.subr.bf16.mxu0 %v753_v0  ;;  %p665_p8 = pnand %p664_p1, %p863_p13  ;;  %p671_p2 = scmp.lt.s32.totalorder %s669_s25, %s663_s15 }
  0x46   : > { %p666_p10 = pneg %p665_p8  ;;  %p672_p3 = por %p671_p2, %p670_p0 }
  0x47   : > { %509 = vmatpush3.bf16.msra.mxu0 %v603_v3 }
  0x48   : > { %510 = vmatprep.subr.bf16.mxu0 %v753_v0  ;;  %p673_p5 = pnand %p672_p3, %p666_p10 }
  0x4b   : > { %511 = vmatpush3.bf16.msra.mxu0 %v604_v4 }
  0x4c   : > { %512 = vmatprep.subr.bf16.mxu0 %v753_v0 }
  0x4f   : > { %513 = vmatpush3.bf16.msra.mxu0 %v605_v5 }
  0x50   : > { %514 = vmatprep.subr.bf16.mxu0 %v753_v0 }
  0x53   : > { %515 = vmatpush3.bf16.msra.mxu0 %v606_v6 }
  0x54   : > { %516 = vmatprep.subr.bf16.mxu0 %v753_v0 }
  0x57   : > { %517 = vmatpush3.bf16.msra.mxu0 %v607_v7 }
  0x58   : > { %518 = vmatprep.subr.bf16.mxu0 %v753_v0 }
  0x5b   : > { %519 = vmatpush3.bf16.msra.mxu0 %v608_v8 }
  0x5e   : > { %521 = vmatmul.mubr.bf16.vlgmr.msra.gmra.mxu0 %v237_v9 }
 0x11e   : > { %v343_v12 = vpop.f32.mrf.mxu0 }
 0x11f   : > { %v344_v13 = vadd.f32 %v482_v10, %v343_v12 }
 0x120   : > { %v522_v14 = vpop.f32.mrf.mxu0 }
 0x121   : > { %v350_v15 = vadd.f32 %v349_v11, %v344_v13 }
 0x122   : > { %v346_v16 = vpop.f32.mrf.mxu0 }
 0x123   : > { %351 = vst [vmem:[%s232_s29] sm:$0xff] %v350_v15 }
 0x124   : > { %v523_v17 = vpop.f32.mrf.mxu0 }
 0x125   : > { %676 = shalt.err (!%p673_p5)
}
 0x126   : > { %s677_s11 = scalar_lea.hbm %s914_s5, 128  ;;  %s681_s26 = scalar_lea.hbm %s965_s3, 256 }
 0x127   : > { %p678_p7 = scmp.ne.s32.totalorder %s914_s5, %s677_s11  ;;  %p682_p9 = scmp.lt.s32.totalorder %s914_s5, %s965_s3 }
 0x128   : > { %p683_p11 = scmp.lt.s32.totalorder %s681_s26, %s677_s11 }
 0x129   : > { %p679_p6 = pnand %p678_p7, %p863_p13 }
 0x12a   : > { %p684_p12 = por %p683_p11, %p682_p9 }
 0x12b   : > { %p680_p4 = pneg %p679_p6 }
 0x12d   : > { %p685_p1 = pnand %p684_p12, %p680_p4 }
 0x12f   : > { %688 = shalt.err (!%p685_p1)
}
 0x130   : > { %530 = dma.vmem_to_hbm [thread:$0]  (%p863_p13), %s916_s30, 128, %s914_s5, %s353_s6  }
 0x131 PF: > { %s379_s24 = sand.u32 1, %s727_s12   ;;  %p977_p8 = scmp.ne.s32.totalorder %s970_s23, 0 }
 0x132   : > { %p978_p10 = scmp.ge.s32.totalorder %s747_s17, 2  ;;  %s380_s27 = scalar_lea.sflag [#allocation4], %s379_s24 }
 0x134   : > { %p541_p0 = pnand %p978_p10, %p977_p8 }
 0x136   : > { %p542_p2 = pneg %p541_p0 }
 0x138   : > { %722 = dma.done.wait (%p542_p2), %s380_s27, 128  }
 0x139   : > { %724 = vsyncadd (%p542_p2), %s380_s27, 4294967168  ;;  %s20_s17 = sadd.s32 1, %s747_s17   ;;  %s979_s12 = smov %s731_s13 }
 0x13a   : > { %p17_p3 = scmp.ge.s32.totalorder %s20_s17, 4   ;;  %s980_s13 = smov %s735_s14 }
 0x13b   : > { %s981_s14 = smov %s872_s19  ;;  %s982_s15 = smov %s743_s16 }
 0x13c   : > { %s983_s16 = smov %s985_s28  ;;  %19 = sbr.rel (!%p17_p3) target bundleno = 7 (0x7), region = 85 }
 0x141   :  { %385 = vsyncpa [#allocation3], 1 }
 0x142   :  { %387 = vsyncpa [#allocation3 + $0x1], 1 }
 0x143   :  { %388 = vsyncpa [#allocation6], 1 }
 0x144   :  { %389 = vsyncpa [#allocation4], 1 }
 0x145   :  { %391 = vsyncpa [#allocation4 + $0x1], 1 }

</bundles_post_ra>
